<compile_context>
chip_gen: v5e
topology: v5e:2x2
jax: 0.10.0
libtpu: 0.0.40
codegen_flags: <defaults>
</compile_context>

<pallas_src>
import jax
import jax.numpy as jnp
from jax.experimental import pallas as pl
from jax.experimental.pallas import tpu as pltpu

LANE = 128


def _round_up(x, m):
    return ((x + m - 1) // m) * m


def actor_kernel(x_ref, w1_ref, b1_ref, w2_ref, b2_ref, w3_ref, b3_ref, mu_ref):
    wdt = w1_ref.dtype  # matmul operand dtype (f32 or bf16); accumulate in f32.
    x = x_ref[...]

    # fc1 + ReLU
    h1 = jnp.dot(x.astype(wdt), w1_ref[...], preferred_element_type=jnp.float32)
    h1 = jnp.maximum(h1 + b1_ref[...].astype(jnp.float32), 0.0)
    # fc2 + ReLU
    h2 = jnp.dot(h1.astype(wdt), w2_ref[...], preferred_element_type=jnp.float32)
    h2 = jnp.maximum(h2 + b2_ref[...].astype(jnp.float32), 0.0)
    # mu head + tanh
    out = jnp.dot(h2.astype(wdt), w3_ref[...], preferred_element_type=jnp.float32)
    out = jnp.tanh(out + b3_ref[...].astype(jnp.float32))

    mu_ref[...] = out.astype(mu_ref.dtype)


def actor_forward(state, params, *, batch_tile=512):
    """state: (B, input_dim) float32.  params: dict from init_actor_params."""
    w1, b1 = params["w1p"], params["b1p"]
    w2, b2 = params["w2p"], params["b2p"]
    w3, b3 = params["w3p"], params["b3p"]
    n_actions = params["n_actions"]

    B, in_dim = state.shape
    # Weights must be in (in_features, out_features) layout (already padded).
    assert w1.shape[0] == in_dim, "w1 must be (input_dim, fc1_pad) layout"
    assert w2.shape[0] == w1.shape[1] and w3.shape[0] == w2.shape[1]
    out_pad = w3.shape[1]

    # Batch tile: multiple of 8 sublanes, clamped for small batches.
    tb = min(batch_tile, _round_up(B, 8))
    tb = _round_up(tb, 8)
    Bp = _round_up(B, tb)
    if Bp != B:
        state = jnp.pad(state, ((0, Bp - B), (0, 0)))
    n_blocks = Bp // tb

    # Advisory cost estimate (padded problem actually executed).
    itm = jnp.dtype(jnp.float32).itemsize
    flops = 2 * Bp * (in_dim * w1.shape[1]
                      + w2.shape[0] * w2.shape[1]
                      + w3.shape[0] * w3.shape[1])
    bytes_accessed = (Bp * in_dim * itm + Bp * out_pad * itm
                      + sum(a.size * a.dtype.itemsize
                            for a in (w1, b1, w2, b2, w3, b3)))
    cost = pl.CostEstimate(flops=flops,
                           transcendentals=Bp * out_pad,
                           bytes_accessed=bytes_accessed)

    # Weights/biases: constant block index -> DMA'd once, VMEM-resident for the
    # whole grid.  Only the state / output tiles stream over the batch axis.
    const2d = lambda a: pl.BlockSpec(a.shape, lambda i: (0, 0))

    mu_pad = pl.pallas_call(
        actor_kernel,
        out_shape=jax.ShapeDtypeStruct((Bp, out_pad), jnp.float32),
        grid=(n_blocks,),
        in_specs=[pl.BlockSpec((tb, in_dim), lambda i: (i, 0)),
                  const2d(w1), const2d(b1),
                  const2d(w2), const2d(b2),
                  const2d(w3), const2d(b3)],
        out_specs=pl.BlockSpec((tb, out_pad), lambda i: (i, 0)),
        compiler_params=pltpu.CompilerParams(
            dimension_semantics=("parallel",)),
        cost_estimate=cost,
    )(state, w1, b1, w2, b2, w3, b3)

    # Slice back to the logical shape (drop batch padding + lane padding).
    return mu_pad[:B, :n_actions]


def init_actor_params(key, input_dim, fc1_dims, fc2_dims, n_actions,
                      dtype=jnp.float32):
    """PyTorch nn.Linear-style init: U(-1/sqrt(fan_in), 1/sqrt(fan_in)).
    Weights are stored (in, out) and zero-padded so every layer width is a
    multiple of 128 lanes; biases stay f32 (elementwise path stays f32)."""
    f1p = _round_up(fc1_dims, LANE)
    f2p = _round_up(fc2_dims, LANE)
    nap = _round_up(n_actions, LANE)

    def linear(key, fan_in, fan_out, in_pad, out_pad):
        kw, kb = jax.random.split(key)
        bound = 1.0 / jnp.sqrt(fan_in)
        w = jax.random.uniform(kw, (fan_in, fan_out), jnp.float32, -bound, bound)
        b = jax.random.uniform(kb, (1, fan_out), jnp.float32, -bound, bound)
        wp = jnp.zeros((in_pad, out_pad), jnp.float32).at[:fan_in, :fan_out].set(w)
        bp = jnp.zeros((1, out_pad), jnp.float32).at[:, :fan_out].set(b)
        return w, b, wp.astype(dtype), bp

    k1, k2, k3 = jax.random.split(key, 3)
    w1, b1, w1p, b1p = linear(k1, input_dim, fc1_dims, input_dim, f1p)
    w2, b2, w2p, b2p = linear(k2, fc1_dims, fc2_dims, f1p, f2p)
    w3, b3, w3p, b3p = linear(k3, fc2_dims, n_actions, f2p, nap)

    return {
        # padded, kernel-facing
        "w1p": w1p, "b1p": b1p, "w2p": w2p, "b2p": b2p, "w3p": w3p, "b3p": b3p,
        # logical, reference-facing
        "w1": w1, "b1": b1, "w2": w2, "b2": b2, "w3": w3, "b3": b3,
        "n_actions": n_actions,
    }


def _reference(state, params):
    h1 = jnp.maximum(state @ params["w1"] + params["b1"], 0.0)
    h2 = jnp.maximum(h1 @ params["w2"] + params["b2"], 0.0)
    return jnp.tanh(h2 @ params["w3"] + params["b3"])


if __name__ == "__main__":
    # Shapes consistent with the module: input_dims=(16,), fc1=32, fc2=32,
    # n_actions=4.
    input_dim, fc1_dims, fc2_dims, n_actions = 16, 32, 32, 4

    key = jax.random.PRNGKey(0)
    k_params, k_s1, k_s2 = jax.random.split(key, 3)
    params = init_actor_params(k_params, input_dim, fc1_dims, fc2_dims, n_actions)

    # (1) Small per-step batch (single grid point).
    state_small = jax.random.normal(k_s1, (8, input_dim), jnp.float32)
    mu_small = actor_forward(state_small, params)
    jax.block_until_ready(mu_small)
    assert mu_small.shape == (8, n_actions)
    assert jnp.allclose(mu_small, _reference(state_small, params), atol=1e-5), \
        "small-batch mismatch vs reference"

    # (2) Larger replay-style batch exercising the batch grid, VMEM-resident
    #     weights, and batch padding (B=300 with a 128-row tile -> grid=(3,)).
    state_big = jax.random.normal(k_s2, (300, input_dim), jnp.float32)
    mu_big = actor_forward(state_big, params, batch_tile=128)
    jax.block_until_ready(mu_big)
    assert mu_big.shape == (300, n_actions)
    assert jnp.allclose(mu_big, _reference(state_big, params), atol=1e-5), \
        "gridded-batch mismatch vs reference"

    print("KERNEL_OK")
</pallas_src>

<mosaic_0001>
module attributes {stable_mosaic.version = 11 : i64} {
  func.func @actor_kernel(%arg0: i32, %arg1: memref<8x16xf32, #tpu.memory_space<vmem>>, %arg2: memref<16x128xf32, #tpu.memory_space<vmem>>, %arg3: memref<1x128xf32, #tpu.memory_space<vmem>>, %arg4: memref<128x128xf32, #tpu.memory_space<vmem>>, %arg5: memref<1x128xf32, #tpu.memory_space<vmem>>, %arg6: memref<128x128xf32, #tpu.memory_space<vmem>>, %arg7: memref<1x128xf32, #tpu.memory_space<vmem>>, %arg8: memref<8x128xf32, #tpu.memory_space<vmem>>) attributes {dimension_semantics = [#tpu.dimension_semantics<parallel>], iteration_bounds = array<i64: 1>, scalar_prefetch = 0 : i64, scratch_operands = 0 : i64, tpu.core_type = #tpu.core_type<tc>, window_params = [{transform_indices = @transform_0, window_bounds = array<i64: 8, 16>}, {pipeline_mode = #tpu.pipeline_mode<synchronous>, transform_indices = @transform_1, window_bounds = array<i64: 16, 128>}, {pipeline_mode = #tpu.pipeline_mode<synchronous>, transform_indices = @transform_2, window_bounds = array<i64: 1, 128>}, {pipeline_mode = #tpu.pipeline_mode<synchronous>, transform_indices = @transform_3, window_bounds = array<i64: 128, 128>}, {pipeline_mode = #tpu.pipeline_mode<synchronous>, transform_indices = @transform_4, window_bounds = array<i64: 1, 128>}, {pipeline_mode = #tpu.pipeline_mode<synchronous>, transform_indices = @transform_5, window_bounds = array<i64: 128, 128>}, {pipeline_mode = #tpu.pipeline_mode<synchronous>, transform_indices = @transform_6, window_bounds = array<i64: 1, 128>}, {transform_indices = @transform_7, window_bounds = array<i64: 8, 128>}]} {
    %c0 = arith.constant 0 : index
    %c0_0 = arith.constant 0 : index
    %0 = vector.load %arg1[%c0, %c0_0] : memref<8x16xf32, #tpu.memory_space<vmem>>, vector<8x16xf32>
    %c0_1 = arith.constant 0 : index
    %c0_2 = arith.constant 0 : index
    %1 = vector.load %arg2[%c0_1, %c0_2] : memref<16x128xf32, #tpu.memory_space<vmem>>, vector<16x128xf32>
    %cst = arith.constant dense<0.000000e+00> : vector<8x128xf32>
    %2 = tpu.matmul %0, %1, %cst {dimension_numbers = #tpu.dot_dimension_numbers<[1], [0], [0], [1], [0, 0, 1, 1], [], []>} : vector<8x16xf32>, vector<16x128xf32>, vector<8x128xf32> -> vector<8x128xf32>
    %c0_3 = arith.constant 0 : index
    %c0_4 = arith.constant 0 : index
    %3 = vector.load %arg3[%c0_3, %c0_4] : memref<1x128xf32, #tpu.memory_space<vmem>>, vector<1x128xf32>
    %4 = vector.broadcast %3 : vector<1x128xf32> to vector<8x128xf32>
    %5 = arith.addf %2, %4 : vector<8x128xf32>
    %cst_5 = arith.constant 0.000000e+00 : f32
    %6 = vector.broadcast %cst_5 : f32 to vector<8x128xf32>
    %7 = arith.maximumf %5, %6 : vector<8x128xf32>
    %c0_6 = arith.constant 0 : index
    %c0_7 = arith.constant 0 : index
    %8 = vector.load %arg4[%c0_6, %c0_7] : memref<128x128xf32, #tpu.memory_space<vmem>>, vector<128x128xf32>
    %cst_8 = arith.constant dense<0.000000e+00> : vector<8x128xf32>
    %9 = tpu.matmul %7, %8, %cst_8 {dimension_numbers = #tpu.dot_dimension_numbers<[1], [0], [0], [1], [0, 0, 1, 1], [], []>} : vector<8x128xf32>, vector<128x128xf32>, vector<8x128xf32> -> vector<8x128xf32>
    %c0_9 = arith.constant 0 : index
    %c0_10 = arith.constant 0 : index
    %10 = vector.load %arg5[%c0_9, %c0_10] : memref<1x128xf32, #tpu.memory_space<vmem>>, vector<1x128xf32>
    %11 = vector.broadcast %10 : vector<1x128xf32> to vector<8x128xf32>
    %12 = arith.addf %9, %11 : vector<8x128xf32>
    %cst_11 = arith.constant 0.000000e+00 : f32
    %13 = vector.broadcast %cst_11 : f32 to vector<8x128xf32>
    %14 = arith.maximumf %12, %13 : vector<8x128xf32>
    %c0_12 = arith.constant 0 : index
    %c0_13 = arith.constant 0 : index
    %15 = vector.load %arg6[%c0_12, %c0_13] : memref<128x128xf32, #tpu.memory_space<vmem>>, vector<128x128xf32>
    %cst_14 = arith.constant dense<0.000000e+00> : vector<8x128xf32>
    %16 = tpu.matmul %14, %15, %cst_14 {dimension_numbers = #tpu.dot_dimension_numbers<[1], [0], [0], [1], [0, 0, 1, 1], [], []>} : vector<8x128xf32>, vector<128x128xf32>, vector<8x128xf32> -> vector<8x128xf32>
    %c0_15 = arith.constant 0 : index
    %c0_16 = arith.constant 0 : index
    %17 = vector.load %arg7[%c0_15, %c0_16] : memref<1x128xf32, #tpu.memory_space<vmem>>, vector<1x128xf32>
    %18 = vector.broadcast %17 : vector<1x128xf32> to vector<8x128xf32>
    %19 = arith.addf %16, %18 : vector<8x128xf32>
    %20 = math.tanh %19 : vector<8x128xf32>
    %c0_17 = arith.constant 0 : index
    %c0_18 = arith.constant 0 : index
    %21 = vector.load %arg8[%c0_17, %c0_18] : memref<8x128xf32, #tpu.memory_space<vmem>>, vector<8x128xf32>
    tpu.vector_store %arg8[%c0_17, %c0_18], %20 {strides = array<i32>} : memref<8x128xf32, #tpu.memory_space<vmem>>, vector<8x128xf32>,
    return
  }
  func.func @transform_0(%arg0: i32) -> (i32, i32) {
    %c0_i32 = arith.constant 0 : i32
    %c0_i32_0 = arith.constant 0 : i32
    return %arg0, %c0_i32 : i32, i32
  }
  func.func @transform_1(%arg0: i32) -> (i32, i32) {
    %c0_i32 = arith.constant 0 : i32
    %c0_i32_0 = arith.constant 0 : i32
    %c0_i32_1 = arith.constant 0 : i32
    return %c0_i32, %c0_i32_0 : i32, i32
  }
  func.func @transform_2(%arg0: i32) -> (i32, i32) {
    %c0_i32 = arith.constant 0 : i32
    %c0_i32_0 = arith.constant 0 : i32
    %c0_i32_1 = arith.constant 0 : i32
    return %c0_i32, %c0_i32_0 : i32, i32
  }
  func.func @transform_3(%arg0: i32) -> (i32, i32) {
    %c0_i32 = arith.constant 0 : i32
    %c0_i32_0 = arith.constant 0 : i32
    %c0_i32_1 = arith.constant 0 : i32
    return %c0_i32, %c0_i32_0 : i32, i32
  }
  func.func @transform_4(%arg0: i32) -> (i32, i32) {
    %c0_i32 = arith.constant 0 : i32
    %c0_i32_0 = arith.constant 0 : i32
    %c0_i32_1 = arith.constant 0 : i32
    return %c0_i32, %c0_i32_0 : i32, i32
  }
  func.func @transform_5(%arg0: i32) -> (i32, i32) {
    %c0_i32 = arith.constant 0 : i32
    %c0_i32_0 = arith.constant 0 : i32
    %c0_i32_1 = arith.constant 0 : i32
    return %c0_i32, %c0_i32_0 : i32, i32
  }
  func.func @transform_6(%arg0: i32) -> (i32, i32) {
    %c0_i32 = arith.constant 0 : i32
    %c0_i32_0 = arith.constant 0 : i32
    %c0_i32_1 = arith.constant 0 : i32
    return %c0_i32, %c0_i32_0 : i32, i32
  }
  func.func @transform_7(%arg0: i32) -> (i32, i32) {
    %c0_i32 = arith.constant 0 : i32
    %c0_i32_0 = arith.constant 0 : i32
    return %arg0, %c0_i32 : i32, i32
  }
}

</mosaic_0001>

<bundles_post_ra>
// kernel: tpu_custom_call.1
= control target key start
LH: loop header
LB: loop body
LE: loop exit
PB: predicated region body
PF: predicated region fallthrough
CT: control target
= control target key end

     0   :  { %12 = vsyncpa [#allocation3], 0  ;;  %s434_s0 = inlined_call_operand.hbm [shape: f32[8,16], index: 0, kind: input, shape index: {}]   ;;  %s435_s1 = inlined_call_operand.hbm [shape: f32[16,128], index: 1, kind: input, shape index: {}]   ;;  %s436_s2 = inlined_call_operand.vmem [shape: f32[1,128], index: 2, kind: input, shape index: {}]   ;;  %s437_s3 = inlined_call_operand.hbm [shape: f32[128,128], index: 3, kind: input, shape index: {}]   ;;  %s438_s4 = inlined_call_operand.vmem [shape: f32[1,128], index: 4, kind: input, shape index: {}]   ;;  %s439_s5 = inlined_call_operand.hbm [shape: f32[128,128], index: 5, kind: input, shape index: {}]   ;;  %s440_s6 = inlined_call_operand.vmem [shape: f32[1,128], index: 6, kind: input, shape index: {}]   ;;  %s441_s7 = inlined_call_operand.hbm [shape: f32[8,128], index: 7, kind: output, shape index: {}]  }
   0x1   :  { %13 = vsyncpa [#allocation6], 0 }
   0x2   :  { %14 = vsyncpa [#allocation9], 0  ;;  %s31_s26 = sshll.u32 %s435_s1, 4  ;;  %s32_s26 = int_to_ptr.hbm [resolvable:$true] %s31_s26 }
   0x3   :  { %15 = vsyncpa [#allocation4], 0  ;;  %s363_s27 = smov [#allocation5]   ;;  %s21_s8 = sshll.u32 %s434_s0, 4  ;;  %s22_s8 = int_to_ptr.hbm [resolvable:$true] %s21_s8 }
   0x4   :  { %s33_s28 = sshll.u32 %s363_s27, 4  ;;  %s364_s9 = smov 128   ;;  %s34_s28 = int_to_ptr.vmem [resolvable:$true] %s33_s28 }
   0x5   :  { %s365_s10 = smov 8   ;;  %s366_s11 = smov [#allocation2]  }
   0x6   :  { %39 = dma.hbm_to_vmem [thread:$0]  %s32_s26, 256, %s34_s28, [#allocation6], %s364_s9, %s364_s9, %s365_s10  }
   0x7   :  { %s23_s12 = sshll.u32 %s366_s11, 4  ;;  %s46_s15 = sshll.u32 %s437_s3, 4  ;;  %s24_s12 = int_to_ptr.vmem [resolvable:$true] %s23_s12  ;;  %s47_s15 = int_to_ptr.hbm [resolvable:$true] %s46_s15 }
   0x8   :  { %26 = dma.hbm_to_vmem [thread:$0]  %s22_s8, 128, %s24_s12, [#allocation3]  }
   0x9   :  { %s61_s17 = sshll.u32 %s439_s5, 4  ;;  %s367_s18 = smov [#allocation7]   ;;  %s62_s17 = int_to_ptr.hbm [resolvable:$true] %s61_s17 }
   0xa   :  { %s48_s19 = sshll.u32 %s367_s18, 4  ;;  %s368_s0 = smov [#allocation8]   ;;  %s49_s19 = int_to_ptr.vmem [resolvable:$true] %s48_s19 }
   0xb   :  { %54 = dma.hbm_to_vmem [thread:$0]  %s47_s15, 2048, %s49_s19, [#allocation6], %s364_s9, %s364_s9, %s365_s10  }
   0xc   :  { %s63_s20 = sshll.u32 %s368_s0, 4  ;;  %s64_s20 = int_to_ptr.vmem [resolvable:$true] %s63_s20 }
   0xd   :  { %69 = dma.hbm_to_vmem [thread:$0]  %s62_s17, 2048, %s64_s20, [#allocation9], %s364_s9, %s364_s9, %s365_s10  }
   0xe   :  { %355 = dma.done.wait [#allocation3], 128  }
   0xf   :  { %356 = vsyncadd [#allocation3], 4294967168 }
  0x10   :  { %357 = dma.done.wait [#allocation6], 2304  }
  0x11   :  { %358 = vsyncadd [#allocation6], 4294964992 }
  0x12   :  { %359 = dma.done.wait [#allocation9], 2048  }
  0x13   :  { %360 = vsyncadd [#allocation9], 4294965248  ;;  %v90_v0 = vld [vmem:[#allocation5 + $0x8] sm:$0xff]  ;;  %v89_v1 = vld [vmem:[#allocation5] sm:$0xff]  ;;  %vm95_vm0 = vcmask 130048   ;;  %s369_s24 = smov [#allocation10]  }
  0x14   :  { %113 = vmatpush.msra.mxu0 %v90_v0  ;;  %v88_v2 = vld [vmem:[#allocation2] sm:$0xff]  ;;  %v135_v3 = vld [vmem:[#allocation7 + $0x78] sm:$0xff]  ;;  %v134_v4 = vld [vmem:[#allocation7 + $0x70] sm:$0xff]  ;;  %s208_s25 = sshll.u32 %s369_s24, 4  ;;  %s210_s28 = sshll.u32 %s441_s7, 4  ;;  %s209_s25 = int_to_ptr.vmem [resolvable:$true] %s208_s25  ;;  %s211_s28 = int_to_ptr.hbm [resolvable:$true] %s210_s28 }
  0x15   :  { %140 = vmatpush.msra.mxu1 %v135_v3  ;;  %v133_v5 = vld [vmem:[#allocation7 + $0x68] sm:$0xff]  ;;  %v132_v6 = vld [vmem:[#allocation7 + $0x60] sm:$0xff]  ;;  %v131_v7 = vld [vmem:[#allocation7 + $0x58] sm:$0xff] }
  0x16   :  { %114 = vmatpush.msra.mxu0 %v89_v1  ;;  %v130_v8 = vld [vmem:[#allocation7 + $0x50] sm:$0xff]  ;;  %v129_v9 = vld [vmem:[#allocation7 + $0x48] sm:$0xff]  ;;  %v128_v10 = vld [vmem:[#allocation7 + $0x40] sm:$0xff] }
  0x17   :  { %222 = vmatmul.msk.f32.vlgmr.msra.gmra.mxu0 %vm95_vm0, %v88_v2  ;;  %141 = vmatpush.msra.mxu1 %v134_v4  ;;  %v127_v11 = vld [vmem:[#allocation7 + $0x38] sm:$0xff]  ;;  %v126_v12 = vld [vmem:[#allocation7 + $0x30] sm:$0xff]  ;;  %v125_v13 = vld [vmem:[#allocation7 + $0x28] sm:$0xff] }
  0x18   :  { %v124_v14 = vld [vmem:[#allocation7 + $0x20] sm:$0xff]  ;;  %v123_v15 = vld [vmem:[#allocation7 + $0x18] sm:$0xff]  ;;  %v122_v16 = vld [vmem:[#allocation7 + $0x10] sm:$0xff] }
  0x19   :  { %142 = vmatpush.msra.mxu1 %v133_v5  ;;  %v121_v17 = vld [vmem:[#allocation7 + $0x8] sm:$0xff]  ;;  %v120_v18 = vld [vmem:[#allocation7] sm:$0xff]  ;;  %v176_v19 = vld [vmem:[#allocation8 + $0x78] sm:$0xff] }
  0x1a   :  { %v175_v20 = vld [vmem:[#allocation8 + $0x70] sm:$0xff]  ;;  %181 = vmatpush.msra.mxu2 %v176_v19  ;;  %v174_v21 = vld [vmem:[#allocation8 + $0x68] sm:$0xff]  ;;  %v173_v22 = vld [vmem:[#allocation8 + $0x60] sm:$0xff] }
  0x1b   :  { %143 = vmatpush.msra.mxu1 %v132_v6  ;;  %v172_v23 = vld [vmem:[#allocation8 + $0x58] sm:$0xff]  ;;  %v171_v24 = vld [vmem:[#allocation8 + $0x50] sm:$0xff]  ;;  %v170_v25 = vld [vmem:[#allocation8 + $0x48] sm:$0xff] }
  0x1c   :  { %182 = vmatpush.msra.mxu2 %v175_v20  ;;  %v169_v26 = vld [vmem:[#allocation8 + $0x40] sm:$0xff]  ;;  %v168_v27 = vld [vmem:[#allocation8 + $0x38] sm:$0xff]  ;;  %v167_v28 = vld [vmem:[#allocation8 + $0x30] sm:$0xff] }
  0x1d   :  { %144 = vmatpush.msra.mxu1 %v131_v7  ;;  %v166_v29 = vld [vmem:[#allocation8 + $0x28] sm:$0xff]  ;;  %v165_v30 = vld [vmem:[#allocation8 + $0x20] sm:$0xff]  ;;  %v164_v31 = vld [vmem:[#allocation8 + $0x18] sm:$0xff] }
  0x1e   :  { %183 = vmatpush.msra.mxu2 %v174_v21  ;;  %v230_v32 = vld [vmem:[%s436_s2] ss:$0 sm:$0xff]  ;;  %v163_v36 = vld [vmem:[#allocation8 + $0x10] sm:$0xff]  ;;  %v161_v38 = vld [vmem:[#allocation8] sm:$0xff] }
  0x1f   :  { %145 = vmatpush.msra.mxu1 %v130_v8  ;;  %v162_v37 = vld [vmem:[#allocation8 + $0x8] sm:$0xff] }
  0x20   :  { %184 = vmatpush.msra.mxu2 %v173_v22  ;;  %v231_v39 = vld [vmem:[%s438_s4] ss:$0 sm:$0xff] }
  0x21   :  { %146 = vmatpush.msra.mxu1 %v129_v9  ;;  %v232_v43 = vld [vmem:[%s440_s6] ss:$0 sm:$0xff] }
  0x22   :  { %185 = vmatpush.msra.mxu2 %v172_v23 }
  0x23   :  { %147 = vmatpush.msra.mxu1 %v128_v10 }
  0x24   :  { %186 = vmatpush.msra.mxu2 %v171_v24 }
  0x25   :  { %148 = vmatpush.msra.mxu1 %v127_v11 }
  0x26   :  { %187 = vmatpush.msra.mxu2 %v170_v25 }
  0x27   :  { %149 = vmatpush.msra.mxu1 %v126_v12 }
  0x28   :  { %188 = vmatpush.msra.mxu2 %v169_v26 }
  0x29   :  { %150 = vmatpush.msra.mxu1 %v125_v13 }
  0x2a   :  { %189 = vmatpush.msra.mxu2 %v168_v27 }
  0x2b   :  { %151 = vmatpush.msra.mxu1 %v124_v14 }
  0x2c   :  { %190 = vmatpush.msra.mxu2 %v167_v28 }
  0x2d   :  { %152 = vmatpush.msra.mxu1 %v123_v15 }
  0x2e   :  { %191 = vmatpush.msra.mxu2 %v166_v29 }
  0x2f   :  { %153 = vmatpush.msra.mxu1 %v122_v16 }
  0x30   :  { %192 = vmatpush.msra.mxu2 %v165_v30 }
  0x31   :  { %154 = vmatpush.msra.mxu1 %v121_v17 }
  0x32   :  { %193 = vmatpush.msra.mxu2 %v164_v31 }
  0x33   :  { %155 = vmatpush.msra.mxu1 %v120_v18 }
  0x34   :  { %194 = vmatpush.msra.mxu2 %v163_v36 }
  0x36   :  { %195 = vmatpush.msra.mxu2 %v162_v37 }
  0x38   :  { %196 = vmatpush.msra.mxu2 %v161_v38 }
  0x94   :  { %v116_v33 = vpop.f32.mrf.mxu0 }
  0x95   :  { %v117_v34 = vadd.f32 %v230_v32, %v116_v33 }
  0x97   :  { %v119_v35 = vmax.f32 %v117_v34, 0.0 }
  0x99   :  { %156 = vmatmul.f32.vlgmr.msra.gmra.mxu1 %v119_v35 }
 0x116   :  { %v157_v40 = vpop.f32.mrf.mxu1 }
 0x117   :  { %v158_v41 = vadd.f32 %v231_v39, %v157_v40 }
 0x119   :  { %v160_v42 = vmax.f32 %v158_v41, 0.0 }
 0x11b   :  { %197 = vmatmul.f32.vlgmr.msra.gmra.mxu2 %v160_v42 }
 0x19e   :  { %v198_v44 = vpop.f32.mrf.mxu2 }
 0x19f   :  { %v199_v45 = vadd.f32 %v232_v43, %v198_v44 }
 0x1a1   :  { %233 = vtanh.f32 %v199_v45 }
 0x1a7   :  { %v234_v46 = vpop.eup %233 }
 0x1a8   :  { %202 = vst [vmem:[#allocation10] sm:$0xff] %v234_v46 }
 0x1a9   :  { %213 = dma.vmem_to_hbm [thread:$0]  %s209_s25, 128, %s211_s28, [#allocation4]  }
 0x1aa   :  { %361 = dma.done.wait [#allocation4], 128  }
 0x1ab   :  { %362 = vsyncadd [#allocation4], 4294967168 }
 0x1ac   :  { %218 = vsyncpa [#allocation3], 1 }
 0x1ad   :  { %219 = vsyncpa [#allocation6], 1 }
 0x1ae   :  { %220 = vsyncpa [#allocation9], 1 }
 0x1af   :  { %221 = vsyncpa [#allocation4], 1 }

</bundles_post_ra>
